<compile_context>
chip_gen: v6e
topology: v6e:2x2x1
jax: 0.10.0
libtpu: 0.0.40
codegen_flags: <defaults>
</compile_context>

<pallas_src>
import functools

import jax
import jax.numpy as jnp
from jax import lax
from jax.experimental import pallas as pl
from jax.experimental.pallas import tpu as pltpu


def seq_lstm_kernel(x_ref, wihT_ref, whhT_ref, b_ref, wlinT_ref, blin_ref,
                    out_ref):
    """Single-call kernel: whole sequence + weights fit in VMEM.

    Hot path (all in-kernel):
      * input projection  X @ W_ih^T          (T, 4H)  -- one MXU matmul
      * unrolled per-step recurrence (h, c register-carried), gates [i,f,g,o]
      * output projection H_all @ W_lin^T + softmax(dim=1)
    """
    T = x_ref.shape[0]
    H = whhT_ref.shape[0]

    # All-timestep input projection (T, 4H), plus combined bias (b_ih + b_hh).
    xg = jnp.dot(x_ref[...], wihT_ref[...],
                 preferred_element_type=jnp.float32) + b_ref[...]

    # Recurrent weights loaded once; (H, 4H) = 4 vregs at H=32, stays resident.
    whhT = whhT_ref[...]

    # Initial hidden/cell state is zeros (module's init_hidden()), carried as
    # values (vregs), never round-tripped through VMEM inside the recurrence.
    h = jnp.zeros((1, H), jnp.float32)
    c = jnp.zeros((1, H), jnp.float32)

    hs = []
    # Static unroll: T is a compile-time constant, so every slice below is
    # static and the LLO scheduler sees the full dependency chain.
    for t in range(T):
        gates = xg[t:t + 1, :] + jnp.dot(h, whhT,
                                         preferred_element_type=jnp.float32)
        i_g = jax.nn.sigmoid(gates[:, 0:H])
        f_g = jax.nn.sigmoid(gates[:, H:2 * H])
        g_g = jnp.tanh(gates[:, 2 * H:3 * H])
        o_g = jax.nn.sigmoid(gates[:, 3 * H:4 * H])
        c = f_g * c + i_g * g_g
        h = o_g * jnp.tanh(c)
        hs.append(h)

    # One bulk (T, H) assembly + one MXU matmul + softmax; single store.
    hall = jnp.concatenate(hs, axis=0)                      # (T, H)
    logits = jnp.dot(hall, wlinT_ref[...],
                     preferred_element_type=jnp.float32) + blin_ref[...]
    m = jnp.max(logits, axis=1, keepdims=True)
    e = jnp.exp(logits - m)
    denom = jnp.sum(e, axis=1, keepdims=True)
    out_ref[...] = e * pl.reciprocal(denom, approx=True)


@functools.partial(jax.jit, static_argnames=())
def sequence_forward(x, wih, whh, b_ih, b_hh, wlin, blin):
    """Wrapper: hoists transposes/bias-combine to XLA, calls the kernel once."""
    T, _ = x.shape
    H = whh.shape[1]
    P = wlin.shape[0]

    wihT = wih.T.astype(jnp.float32)                 # (D, 4H)
    whhT = whh.T.astype(jnp.float32)                 # (H, 4H)
    wlinT = wlin.T.astype(jnp.float32)               # (H, P)
    b = (b_ih + b_hh).reshape(1, 4 * H).astype(jnp.float32)
    blin2 = blin.reshape(1, P).astype(jnp.float32)

    return pl.pallas_call(
        seq_lstm_kernel,
        out_shape=jax.ShapeDtypeStruct((T, P), jnp.float32),
        in_specs=[pl.BlockSpec(memory_space=pltpu.MemorySpace.VMEM)] * 6,
        out_specs=pl.BlockSpec(memory_space=pltpu.MemorySpace.VMEM),
    )(x.astype(jnp.float32), wihT, whhT, b, wlinT, blin2)


def sequence_forward_ref(x, wih, whh, b_ih, b_hh, wlin, blin):
    """Pure-JAX reference (matches PyTorch LSTM semantics, batch=1)."""
    H = whh.shape[1]

    def step(carry, x_t):
        h, c = carry
        gates = x_t @ wih.T + h @ whh.T + b_ih + b_hh
        i = jax.nn.sigmoid(gates[0:H])
        f = jax.nn.sigmoid(gates[H:2 * H])
        g = jnp.tanh(gates[2 * H:3 * H])
        o = jax.nn.sigmoid(gates[3 * H:4 * H])
        c = f * c + i * g
        h = o * jnp.tanh(c)
        return (h, c), h

    h0 = jnp.zeros((H,), jnp.float32)
    (_, _), hs = lax.scan(step, (h0, h0), x)
    logits = hs @ wlin.T + blin
    return jax.nn.softmax(logits, axis=1)


if __name__ == "__main__":
    # Small shapes consistent with the module's forward.
    T = 8            # sequence length
    D = 16           # input_dim
    H = 32           # hidden_dim
    P = 8            # num_pitches

    key = jax.random.PRNGKey(0)
    ks = jax.random.split(key, 8)
    scale = 1.0 / jnp.sqrt(H)

    x = jax.random.normal(ks[0], (T, D), dtype=jnp.float32)
    wih = jax.random.uniform(ks[1], (4 * H, D), jnp.float32, -scale, scale)
    whh = jax.random.uniform(ks[2], (4 * H, H), jnp.float32, -scale, scale)
    b_ih = jax.random.uniform(ks[3], (4 * H,), jnp.float32, -scale, scale)
    b_hh = jax.random.uniform(ks[4], (4 * H,), jnp.float32, -scale, scale)
    wlin = jax.random.uniform(ks[5], (P, H), jnp.float32, -scale, scale)
    blin = jax.random.uniform(ks[6], (P,), jnp.float32, -scale, scale)

    out = sequence_forward(x, wih, whh, b_ih, b_hh, wlin, blin)
    out = jax.block_until_ready(out)

    ref = sequence_forward_ref(x, wih, whh, b_ih, b_hh, wlin, blin)
    assert out.shape == (T, P)
    # Tolerance accounts for the EUP approximate-reciprocal in the softmax
    # normalization (~1e-4 relative); everything else is exact f32.
    assert jnp.allclose(out, ref, atol=2e-3, rtol=2e-3), (
        f"max abs err {jnp.max(jnp.abs(out - ref))}")
    # Rows must still sum to ~1 and pick the same pitch as the reference.
    assert jnp.allclose(jnp.sum(out, axis=1), 1.0, atol=2e-3)
    assert jnp.all(jnp.argmax(out, axis=1) == jnp.argmax(ref, axis=1))

    print("KERNEL_OK")
</pallas_src>

<mosaic_0001>
module attributes {stable_mosaic.version = 11 : i64} {
  func.func @seq_lstm_kernel(%arg0: memref<8x16xf32, #tpu.memory_space<vmem>>, %arg1: memref<16x128xf32, #tpu.memory_space<vmem>>, %arg2: memref<32x128xf32, #tpu.memory_space<vmem>>, %arg3: memref<1x128xf32, #tpu.memory_space<vmem>>, %arg4: memref<32x8xf32, #tpu.memory_space<vmem>>, %arg5: memref<1x8xf32, #tpu.memory_space<vmem>>, %arg6: memref<8x8xf32, #tpu.memory_space<vmem>>) attributes {dimension_semantics = [], scalar_prefetch = 0 : i64, scratch_operands = 0 : i64, tpu.core_type = #tpu.core_type<tc>} {
    %c0 = arith.constant 0 : index
    %c0_0 = arith.constant 0 : index
    %0 = vector.load %arg0[%c0, %c0_0] : memref<8x16xf32, #tpu.memory_space<vmem>>, vector<8x16xf32>
    %c0_1 = arith.constant 0 : index
    %c0_2 = arith.constant 0 : index
    %1 = vector.load %arg1[%c0_1, %c0_2] : memref<16x128xf32, #tpu.memory_space<vmem>>, vector<16x128xf32>
    %cst = arith.constant dense<0.000000e+00> : vector<8x128xf32>
    %2 = tpu.matmul %0, %1, %cst {dimension_numbers = #tpu.dot_dimension_numbers<[1], [0], [0], [1], [0, 0, 1, 1], [], []>} : vector<8x16xf32>, vector<16x128xf32>, vector<8x128xf32> -> vector<8x128xf32>
    %c0_3 = arith.constant 0 : index
    %c0_4 = arith.constant 0 : index
    %3 = vector.load %arg3[%c0_3, %c0_4] : memref<1x128xf32, #tpu.memory_space<vmem>>, vector<1x128xf32>
    %4 = vector.broadcast %3 : vector<1x128xf32> to vector<8x128xf32>
    %5 = arith.addf %2, %4 : vector<8x128xf32>
    %c0_5 = arith.constant 0 : index
    %c0_6 = arith.constant 0 : index
    %6 = vector.load %arg2[%c0_5, %c0_6] : memref<32x128xf32, #tpu.memory_space<vmem>>, vector<32x128xf32>
    %cst_7 = arith.constant 0.000000e+00 : f32
    %7 = vector.broadcast %cst_7 : f32 to vector<1x32xf32>
    %cst_8 = arith.constant 0.000000e+00 : f32
    %8 = vector.broadcast %cst_8 : f32 to vector<1x32xf32>
    %9 = vector.extract_strided_slice %5 {offsets = [0, 0], sizes = [1, 128], strides = [1, 1]} : vector<8x128xf32> to vector<1x128xf32>
    %cst_9 = arith.constant dense<0.000000e+00> : vector<1x128xf32>
    %10 = tpu.matmul %7, %6, %cst_9 {dimension_numbers = #tpu.dot_dimension_numbers<[1], [0], [0], [1], [0, 0, 1, 1], [], []>} : vector<1x32xf32>, vector<32x128xf32>, vector<1x128xf32> -> vector<1x128xf32>
    %11 = arith.addf %9, %10 : vector<1x128xf32>
    %12 = vector.extract_strided_slice %11 {offsets = [0, 0], sizes = [1, 32], strides = [1, 1]} : vector<1x128xf32> to vector<1x32xf32>
    %13 = arith.negf %12 : vector<1x32xf32>
    %14 = math.exp %13 : vector<1x32xf32>
    %cst_10 = arith.constant 1.000000e+00 : f32
    %15 = vector.broadcast %cst_10 : f32 to vector<1x32xf32>
    %16 = arith.addf %15, %14 : vector<1x32xf32>
    %17 = arith.divf %15, %16 : vector<1x32xf32>
    %18 = vector.extract_strided_slice %11 {offsets = [0, 32], sizes = [1, 32], strides = [1, 1]} : vector<1x128xf32> to vector<1x32xf32>
    %19 = arith.negf %18 : vector<1x32xf32>
    %20 = math.exp %19 : vector<1x32xf32>
    %cst_11 = arith.constant 1.000000e+00 : f32
    %21 = vector.broadcast %cst_11 : f32 to vector<1x32xf32>
    %22 = arith.addf %21, %20 : vector<1x32xf32>
    %23 = arith.divf %21, %22 : vector<1x32xf32>
    %24 = vector.extract_strided_slice %11 {offsets = [0, 64], sizes = [1, 32], strides = [1, 1]} : vector<1x128xf32> to vector<1x32xf32>
    %25 = math.tanh %24 : vector<1x32xf32>
    %26 = vector.extract_strided_slice %11 {offsets = [0, 96], sizes = [1, 32], strides = [1, 1]} : vector<1x128xf32> to vector<1x32xf32>
    %27 = arith.negf %26 : vector<1x32xf32>
    %28 = math.exp %27 : vector<1x32xf32>
    %cst_12 = arith.constant 1.000000e+00 : f32
    %29 = vector.broadcast %cst_12 : f32 to vector<1x32xf32>
    %30 = arith.addf %29, %28 : vector<1x32xf32>
    %31 = arith.divf %29, %30 : vector<1x32xf32>
    %32 = arith.mulf %23, %8 : vector<1x32xf32>
    %33 = arith.mulf %17, %25 : vector<1x32xf32>
    %34 = arith.addf %32, %33 : vector<1x32xf32>
    %35 = math.tanh %34 : vector<1x32xf32>
    %36 = arith.mulf %31, %35 : vector<1x32xf32>
    %37 = vector.extract_strided_slice %5 {offsets = [1, 0], sizes = [1, 128], strides = [1, 1]} : vector<8x128xf32> to vector<1x128xf32>
    %cst_13 = arith.constant dense<0.000000e+00> : vector<1x128xf32>
    %38 = tpu.matmul %36, %6, %cst_13 {dimension_numbers = #tpu.dot_dimension_numbers<[1], [0], [0], [1], [0, 0, 1, 1], [], []>} : vector<1x32xf32>, vector<32x128xf32>, vector<1x128xf32> -> vector<1x128xf32>
    %39 = arith.addf %37, %38 : vector<1x128xf32>
    %40 = vector.extract_strided_slice %39 {offsets = [0, 0], sizes = [1, 32], strides = [1, 1]} : vector<1x128xf32> to vector<1x32xf32>
    %41 = arith.negf %40 : vector<1x32xf32>
    %42 = math.exp %41 : vector<1x32xf32>
    %cst_14 = arith.constant 1.000000e+00 : f32
    %43 = vector.broadcast %cst_14 : f32 to vector<1x32xf32>
    %44 = arith.addf %43, %42 : vector<1x32xf32>
    %45 = arith.divf %43, %44 : vector<1x32xf32>
    %46 = vector.extract_strided_slice %39 {offsets = [0, 32], sizes = [1, 32], strides = [1, 1]} : vector<1x128xf32> to vector<1x32xf32>
    %47 = arith.negf %46 : vector<1x32xf32>
    %48 = math.exp %47 : vector<1x32xf32>
    %cst_15 = arith.constant 1.000000e+00 : f32
    %49 = vector.broadcast %cst_15 : f32 to vector<1x32xf32>
    %50 = arith.addf %49, %48 : vector<1x32xf32>
    %51 = arith.divf %49, %50 : vector<1x32xf32>
    %52 = vector.extract_strided_slice %39 {offsets = [0, 64], sizes = [1, 32], strides = [1, 1]} : vector<1x128xf32> to vector<1x32xf32>
    %53 = math.tanh %52 : vector<1x32xf32>
    %54 = vector.extract_strided_slice %39 {offsets = [0, 96], sizes = [1, 32], strides = [1, 1]} : vector<1x128xf32> to vector<1x32xf32>
    %55 = arith.negf %54 : vector<1x32xf32>
    %56 = math.exp %55 : vector<1x32xf32>
    %cst_16 = arith.constant 1.000000e+00 : f32
    %57 = vector.broadcast %cst_16 : f32 to vector<1x32xf32>
    %58 = arith.addf %57, %56 : vector<1x32xf32>
    %59 = arith.divf %57, %58 : vector<1x32xf32>
    %60 = arith.mulf %51, %34 : vector<1x32xf32>
    %61 = arith.mulf %45, %53 : vector<1x32xf32>
    %62 = arith.addf %60, %61 : vector<1x32xf32>
    %63 = math.tanh %62 : vector<1x32xf32>
    %64 = arith.mulf %59, %63 : vector<1x32xf32>
    %65 = vector.extract_strided_slice %5 {offsets = [2, 0], sizes = [1, 128], strides = [1, 1]} : vector<8x128xf32> to vector<1x128xf32>
    %cst_17 = arith.constant dense<0.000000e+00> : vector<1x128xf32>
    %66 = tpu.matmul %64, %6, %cst_17 {dimension_numbers = #tpu.dot_dimension_numbers<[1], [0], [0], [1], [0, 0, 1, 1], [], []>} : vector<1x32xf32>, vector<32x128xf32>, vector<1x128xf32> -> vector<1x128xf32>
    %67 = arith.addf %65, %66 : vector<1x128xf32>
    %68 = vector.extract_strided_slice %67 {offsets = [0, 0], sizes = [1, 32], strides = [1, 1]} : vector<1x128xf32> to vector<1x32xf32>
    %69 = arith.negf %68 : vector<1x32xf32>
    %70 = math.exp %69 : vector<1x32xf32>
    %cst_18 = arith.constant 1.000000e+00 : f32
    %71 = vector.broadcast %cst_18 : f32 to vector<1x32xf32>
    %72 = arith.addf %71, %70 : vector<1x32xf32>
    %73 = arith.divf %71, %72 : vector<1x32xf32>
    %74 = vector.extract_strided_slice %67 {offsets = [0, 32], sizes = [1, 32], strides = [1, 1]} : vector<1x128xf32> to vector<1x32xf32>
    %75 = arith.negf %74 : vector<1x32xf32>
    %76 = math.exp %75 : vector<1x32xf32>
    %cst_19 = arith.constant 1.000000e+00 : f32
    %77 = vector.broadcast %cst_19 : f32 to vector<1x32xf32>
    %78 = arith.addf %77, %76 : vector<1x32xf32>
    %79 = arith.divf %77, %78 : vector<1x32xf32>
    %80 = vector.extract_strided_slice %67 {offsets = [0, 64], sizes = [1, 32], strides = [1, 1]} : vector<1x128xf32> to vector<1x32xf32>
    %81 = math.tanh %80 : vector<1x32xf32>
    %82 = vector.extract_strided_slice %67 {offsets = [0, 96], sizes = [1, 32], strides = [1, 1]} : vector<1x128xf32> to vector<1x32xf32>
    %83 = arith.negf %82 : vector<1x32xf32>
    %84 = math.exp %83 : vector<1x32xf32>
    %cst_20 = arith.constant 1.000000e+00 : f32
    %85 = vector.broadcast %cst_20 : f32 to vector<1x32xf32>
    %86 = arith.addf %85, %84 : vector<1x32xf32>
    %87 = arith.divf %85, %86 : vector<1x32xf32>
    %88 = arith.mulf %79, %62 : vector<1x32xf32>
    %89 = arith.mulf %73, %81 : vector<1x32xf32>
    %90 = arith.addf %88, %89 : vector<1x32xf32>
    %91 = math.tanh %90 : vector<1x32xf32>
    %92 = arith.mulf %87, %91 : vector<1x32xf32>
    %93 = vector.extract_strided_slice %5 {offsets = [3, 0], sizes = [1, 128], strides = [1, 1]} : vector<8x128xf32> to vector<1x128xf32>
    %cst_21 = arith.constant dense<0.000000e+00> : vector<1x128xf32>
    %94 = tpu.matmul %92, %6, %cst_21 {dimension_numbers = #tpu.dot_dimension_numbers<[1], [0], [0], [1], [0, 0, 1, 1], [], []>} : vector<1x32xf32>, vector<32x128xf32>, vector<1x128xf32> -> vector<1x128xf32>
    %95 = arith.addf %93, %94 : vector<1x128xf32>
    %96 = vector.extract_strided_slice %95 {offsets = [0, 0], sizes = [1, 32], strides = [1, 1]} : vector<1x128xf32> to vector<1x32xf32>
    %97 = arith.negf %96 : vector<1x32xf32>
    %98 = math.exp %97 : vector<1x32xf32>
    %cst_22 = arith.constant 1.000000e+00 : f32
    %99 = vector.broadcast %cst_22 : f32 to vector<1x32xf32>
    %100 = arith.addf %99, %98 : vector<1x32xf32>
    %101 = arith.divf %99, %100 : vector<1x32xf32>
    %102 = vector.extract_strided_slice %95 {offsets = [0, 32], sizes = [1, 32], strides = [1, 1]} : vector<1x128xf32> to vector<1x32xf32>
    %103 = arith.negf %102 : vector<1x32xf32>
    %104 = math.exp %103 : vector<1x32xf32>
    %cst_23 = arith.constant 1.000000e+00 : f32
    %105 = vector.broadcast %cst_23 : f32 to vector<1x32xf32>
    %106 = arith.addf %105, %104 : vector<1x32xf32>
    %107 = arith.divf %105, %106 : vector<1x32xf32>
    %108 = vector.extract_strided_slice %95 {offsets = [0, 64], sizes = [1, 32], strides = [1, 1]} : vector<1x128xf32> to vector<1x32xf32>
    %109 = math.tanh %108 : vector<1x32xf32>
    %110 = vector.extract_strided_slice %95 {offsets = [0, 96], sizes = [1, 32], strides = [1, 1]} : vector<1x128xf32> to vector<1x32xf32>
    %111 = arith.negf %110 : vector<1x32xf32>
    %112 = math.exp %111 : vector<1x32xf32>
    %cst_24 = arith.constant 1.000000e+00 : f32
    %113 = vector.broadcast %cst_24 : f32 to vector<1x32xf32>
    %114 = arith.addf %113, %112 : vector<1x32xf32>
    %115 = arith.divf %113, %114 : vector<1x32xf32>
    %116 = arith.mulf %107, %90 : vector<1x32xf32>
    %117 = arith.mulf %101, %109 : vector<1x32xf32>
    %118 = arith.addf %116, %117 : vector<1x32xf32>
    %119 = math.tanh %118 : vector<1x32xf32>
    %120 = arith.mulf %115, %119 : vector<1x32xf32>
    %121 = vector.extract_strided_slice %5 {offsets = [4, 0], sizes = [1, 128], strides = [1, 1]} : vector<8x128xf32> to vector<1x128xf32>
    %cst_25 = arith.constant dense<0.000000e+00> : vector<1x128xf32>
    %122 = tpu.matmul %120, %6, %cst_25 {dimension_numbers = #tpu.dot_dimension_numbers<[1], [0], [0], [1], [0, 0, 1, 1], [], []>} : vector<1x32xf32>, vector<32x128xf32>, vector<1x128xf32> -> vector<1x128xf32>
    %123 = arith.addf %121, %122 : vector<1x128xf32>
    %124 = vector.extract_strided_slice %123 {offsets = [0, 0], sizes = [1, 32], strides = [1, 1]} : vector<1x128xf32> to vector<1x32xf32>
    %125 = arith.negf %124 : vector<1x32xf32>
    %126 = math.exp %125 : vector<1x32xf32>
    %cst_26 = arith.constant 1.000000e+00 : f32
    %127 = vector.broadcast %cst_26 : f32 to vector<1x32xf32>
    %128 = arith.addf %127, %126 : vector<1x32xf32>
    %129 = arith.divf %127, %128 : vector<1x32xf32>
    %130 = vector.extract_strided_slice %123 {offsets = [0, 32], sizes = [1, 32], strides = [1, 1]} : vector<1x128xf32> to vector<1x32xf32>
    %131 = arith.negf %130 : vector<1x32xf32>
    %132 = math.exp %131 : vector<1x32xf32>
    %cst_27 = arith.constant 1.000000e+00 : f32
    %133 = vector.broadcast %cst_27 : f32 to vector<1x32xf32>
    %134 = arith.addf %133, %132 : vector<1x32xf32>
    %135 = arith.divf %133, %134 : vector<1x32xf32>
    %136 = vector.extract_strided_slice %123 {offsets = [0, 64], sizes = [1, 32], strides = [1, 1]} : vector<1x128xf32> to vector<1x32xf32>
    %137 = math.tanh %136 : vector<1x32xf32>
    %138 = vector.extract_strided_slice %123 {offsets = [0, 96], sizes = [1, 32], strides = [1, 1]} : vector<1x128xf32> to vector<1x32xf32>
    %139 = arith.negf %138 : vector<1x32xf32>
    %140 = math.exp %139 : vector<1x32xf32>
    %cst_28 = arith.constant 1.000000e+00 : f32
    %141 = vector.broadcast %cst_28 : f32 to vector<1x32xf32>
    %142 = arith.addf %141, %140 : vector<1x32xf32>
    %143 = arith.divf %141, %142 : vector<1x32xf32>
    %144 = arith.mulf %135, %118 : vector<1x32xf32>
    %145 = arith.mulf %129, %137 : vector<1x32xf32>
    %146 = arith.addf %144, %145 : vector<1x32xf32>
    %147 = math.tanh %146 : vector<1x32xf32>
    %148 = arith.mulf %143, %147 : vector<1x32xf32>
    %149 = vector.extract_strided_slice %5 {offsets = [5, 0], sizes = [1, 128], strides = [1, 1]} : vector<8x128xf32> to vector<1x128xf32>
    %cst_29 = arith.constant dense<0.000000e+00> : vector<1x128xf32>
    %150 = tpu.matmul %148, %6, %cst_29 {dimension_numbers = #tpu.dot_dimension_numbers<[1], [0], [0], [1], [0, 0, 1, 1], [], []>} : vector<1x32xf32>, vector<32x128xf32>, vector<1x128xf32> -> vector<1x128xf32>
    %151 = arith.addf %149, %150 : vector<1x128xf32>
    %152 = vector.extract_strided_slice %151 {offsets = [0, 0], sizes = [1, 32], strides = [1, 1]} : vector<1x128xf32> to vector<1x32xf32>
    %153 = arith.negf %152 : vector<1x32xf32>
    %154 = math.exp %153 : vector<1x32xf32>
    %cst_30 = arith.constant 1.000000e+00 : f32
    %155 = vector.broadcast %cst_30 : f32 to vector<1x32xf32>
    %156 = arith.addf %155, %154 : vector<1x32xf32>
    %157 = arith.divf %155, %156 : vector<1x32xf32>
    %158 = vector.extract_strided_slice %151 {offsets = [0, 32], sizes = [1, 32], strides = [1, 1]} : vector<1x128xf32> to vector<1x32xf32>
    %159 = arith.negf %158 : vector<1x32xf32>
    %160 = math.exp %159 : vector<1x32xf32>
    %cst_31 = arith.constant 1.000000e+00 : f32
    %161 = vector.broadcast %cst_31 : f32 to vector<1x32xf32>
    %162 = arith.addf %161, %160 : vector<1x32xf32>
    %163 = arith.divf %161, %162 : vector<1x32xf32>
    %164 = vector.extract_strided_slice %151 {offsets = [0, 64], sizes = [1, 32], strides = [1, 1]} : vector<1x128xf32> to vector<1x32xf32>
    %165 = math.tanh %164 : vector<1x32xf32>
    %166 = vector.extract_strided_slice %151 {offsets = [0, 96], sizes = [1, 32], strides = [1, 1]} : vector<1x128xf32> to vector<1x32xf32>
    %167 = arith.negf %166 : vector<1x32xf32>
    %168 = math.exp %167 : vector<1x32xf32>
    %cst_32 = arith.constant 1.000000e+00 : f32
    %169 = vector.broadcast %cst_32 : f32 to vector<1x32xf32>
    %170 = arith.addf %169, %168 : vector<1x32xf32>
    %171 = arith.divf %169, %170 : vector<1x32xf32>
    %172 = arith.mulf %163, %146 : vector<1x32xf32>
    %173 = arith.mulf %157, %165 : vector<1x32xf32>
    %174 = arith.addf %172, %173 : vector<1x32xf32>
    %175 = math.tanh %174 : vector<1x32xf32>
    %176 = arith.mulf %171, %175 : vector<1x32xf32>
    %177 = vector.extract_strided_slice %5 {offsets = [6, 0], sizes = [1, 128], strides = [1, 1]} : vector<8x128xf32> to vector<1x128xf32>
    %cst_33 = arith.constant dense<0.000000e+00> : vector<1x128xf32>
    %178 = tpu.matmul %176, %6, %cst_33 {dimension_numbers = #tpu.dot_dimension_numbers<[1], [0], [0], [1], [0, 0, 1, 1], [], []>} : vector<1x32xf32>, vector<32x128xf32>, vector<1x128xf32> -> vector<1x128xf32>
    %179 = arith.addf %177, %178 : vector<1x128xf32>
    %180 = vector.extract_strided_slice %179 {offsets = [0, 0], sizes = [1, 32], strides = [1, 1]} : vector<1x128xf32> to vector<1x32xf32>
    %181 = arith.negf %180 : vector<1x32xf32>
    %182 = math.exp %181 : vector<1x32xf32>
    %cst_34 = arith.constant 1.000000e+00 : f32
    %183 = vector.broadcast %cst_34 : f32 to vector<1x32xf32>
    %184 = arith.addf %183, %182 : vector<1x32xf32>
    %185 = arith.divf %183, %184 : vector<1x32xf32>
    %186 = vector.extract_strided_slice %179 {offsets = [0, 32], sizes = [1, 32], strides = [1, 1]} : vector<1x128xf32> to vector<1x32xf32>
    %187 = arith.negf %186 : vector<1x32xf32>
    %188 = math.exp %187 : vector<1x32xf32>
    %cst_35 = arith.constant 1.000000e+00 : f32
    %189 = vector.broadcast %cst_35 : f32 to vector<1x32xf32>
    %190 = arith.addf %189, %188 : vector<1x32xf32>
    %191 = arith.divf %189, %190 : vector<1x32xf32>
    %192 = vector.extract_strided_slice %179 {offsets = [0, 64], sizes = [1, 32], strides = [1, 1]} : vector<1x128xf32> to vector<1x32xf32>
    %193 = math.tanh %192 : vector<1x32xf32>
    %194 = vector.extract_strided_slice %179 {offsets = [0, 96], sizes = [1, 32], strides = [1, 1]} : vector<1x128xf32> to vector<1x32xf32>
    %195 = arith.negf %194 : vector<1x32xf32>
    %196 = math.exp %195 : vector<1x32xf32>
    %cst_36 = arith.constant 1.000000e+00 : f32
    %197 = vector.broadcast %cst_36 : f32 to vector<1x32xf32>
    %198 = arith.addf %197, %196 : vector<1x32xf32>
    %199 = arith.divf %197, %198 : vector<1x32xf32>
    %200 = arith.mulf %191, %174 : vector<1x32xf32>
    %201 = arith.mulf %185, %193 : vector<1x32xf32>
    %202 = arith.addf %200, %201 : vector<1x32xf32>
    %203 = math.tanh %202 : vector<1x32xf32>
    %204 = arith.mulf %199, %203 : vector<1x32xf32>
    %205 = vector.extract_strided_slice %5 {offsets = [7, 0], sizes = [1, 128], strides = [1, 1]} : vector<8x128xf32> to vector<1x128xf32>
    %cst_37 = arith.constant dense<0.000000e+00> : vector<1x128xf32>
    %206 = tpu.matmul %204, %6, %cst_37 {dimension_numbers = #tpu.dot_dimension_numbers<[1], [0], [0], [1], [0, 0, 1, 1], [], []>} : vector<1x32xf32>, vector<32x128xf32>, vector<1x128xf32> -> vector<1x128xf32>
    %207 = arith.addf %205, %206 : vector<1x128xf32>
    %208 = vector.extract_strided_slice %207 {offsets = [0, 0], sizes = [1, 32], strides = [1, 1]} : vector<1x128xf32> to vector<1x32xf32>
    %209 = arith.negf %208 : vector<1x32xf32>
    %210 = math.exp %209 : vector<1x32xf32>
    %cst_38 = arith.constant 1.000000e+00 : f32
    %211 = vector.broadcast %cst_38 : f32 to vector<1x32xf32>
    %212 = arith.addf %211, %210 : vector<1x32xf32>
    %213 = arith.divf %211, %212 : vector<1x32xf32>
    %214 = vector.extract_strided_slice %207 {offsets = [0, 32], sizes = [1, 32], strides = [1, 1]} : vector<1x128xf32> to vector<1x32xf32>
    %215 = arith.negf %214 : vector<1x32xf32>
    %216 = math.exp %215 : vector<1x32xf32>
    %cst_39 = arith.constant 1.000000e+00 : f32
    %217 = vector.broadcast %cst_39 : f32 to vector<1x32xf32>
    %218 = arith.addf %217, %216 : vector<1x32xf32>
    %219 = arith.divf %217, %218 : vector<1x32xf32>
    %220 = vector.extract_strided_slice %207 {offsets = [0, 64], sizes = [1, 32], strides = [1, 1]} : vector<1x128xf32> to vector<1x32xf32>
    %221 = math.tanh %220 : vector<1x32xf32>
    %222 = vector.extract_strided_slice %207 {offsets = [0, 96], sizes = [1, 32], strides = [1, 1]} : vector<1x128xf32> to vector<1x32xf32>
    %223 = arith.negf %222 : vector<1x32xf32>
    %224 = math.exp %223 : vector<1x32xf32>
    %cst_40 = arith.constant 1.000000e+00 : f32
    %225 = vector.broadcast %cst_40 : f32 to vector<1x32xf32>
    %226 = arith.addf %225, %224 : vector<1x32xf32>
    %227 = arith.divf %225, %226 : vector<1x32xf32>
    %228 = arith.mulf %219, %202 : vector<1x32xf32>
    %229 = arith.mulf %213, %221 : vector<1x32xf32>
    %230 = arith.addf %228, %229 : vector<1x32xf32>
    %231 = math.tanh %230 : vector<1x32xf32>
    %232 = arith.mulf %227, %231 : vector<1x32xf32>
    %233 = tpu.concatenate %36, %64, %92, %120, %148, %176, %204, %232 in 0 : vector<1x32xf32>, vector<1x32xf32>, vector<1x32xf32>, vector<1x32xf32>, vector<1x32xf32>, vector<1x32xf32>, vector<1x32xf32>, vector<1x32xf32> -> vector<8x32xf32>
    %c0_41 = arith.constant 0 : index
    %c0_42 = arith.constant 0 : index
    %234 = vector.load %arg4[%c0_41, %c0_42] : memref<32x8xf32, #tpu.memory_space<vmem>>, vector<32x8xf32>
    %cst_43 = arith.constant dense<0.000000e+00> : vector<8x8xf32>
    %235 = tpu.matmul %233, %234, %cst_43 {dimension_numbers = #tpu.dot_dimension_numbers<[1], [0], [0], [1], [0, 0, 1, 1], [], []>} : vector<8x32xf32>, vector<32x8xf32>, vector<8x8xf32> -> vector<8x8xf32>
    %c0_44 = arith.constant 0 : index
    %c0_45 = arith.constant 0 : index
    %236 = vector.load %arg5[%c0_44, %c0_45] : memref<1x8xf32, #tpu.memory_space<vmem>>, vector<1x8xf32>
    %237 = vector.broadcast %236 : vector<1x8xf32> to vector<8x8xf32>
    %238 = arith.addf %235, %237 : vector<8x8xf32>
    %cst_46 = arith.constant dense<0xFF800000> : vector<8xf32>
    %239 = vector.multi_reduction <maximumf>, %238, %cst_46 [1] : vector<8x8xf32> to vector<8xf32>
    %240 = vector.shape_cast %239 : vector<8xf32> to vector<8x1xf32>
    %241 = vector.broadcast %240 : vector<8x1xf32> to vector<8x8xf32>
    %242 = arith.subf %238, %241 : vector<8x8xf32>
    %243 = math.exp %242 : vector<8x8xf32>
    %cst_47 = arith.constant dense<0.000000e+00> : vector<8xf32>
    %244 = vector.multi_reduction <add>, %243, %cst_47 [1] : vector<8x8xf32> to vector<8xf32>
    %245 = vector.shape_cast %244 : vector<8xf32> to vector<8x1xf32>
    %246 = tpu.reciprocal %245 {approx = true} : vector<8x1xf32> -> vector<8x1xf32>
    %247 = vector.broadcast %246 : vector<8x1xf32> to vector<8x8xf32>
    %248 = arith.mulf %243, %247 : vector<8x8xf32>
    %c0_48 = arith.constant 0 : index
    %c0_49 = arith.constant 0 : index
    %249 = vector.load %arg6[%c0_48, %c0_49] : memref<8x8xf32, #tpu.memory_space<vmem>>, vector<8x8xf32>
    tpu.vector_store %arg6[%c0_48, %c0_49], %248 {strides = array<i32>} : memref<8x8xf32, #tpu.memory_space<vmem>>, vector<8x8xf32>,
    return
  }
}

</mosaic_0001>

<bundles_post_ra>
// kernel: sequence_forward.1
= control target key start
LH: loop header
LB: loop body
LE: loop exit
PB: predicated region body
PF: predicated region fallthrough
CT: control target
= control target key end

     0   :  { %11 = vsyncpa [#allocation3], 0  ;;  %s1629_s0 = inlined_call_operand.hbm [shape: f32[8,16], index: 0, kind: input, shape index: {}]   ;;  %s1630_s1 = inlined_call_operand.vmem [shape: f32[16,128], index: 1, kind: input, shape index: {}]   ;;  %s1631_s2 = inlined_call_operand.vmem [shape: f32[32,128], index: 2, kind: input, shape index: {}]   ;;  %s1632_s3 = inlined_call_operand.vmem [shape: f32[1,128], index: 3, kind: input, shape index: {}]   ;;  %s1633_s4 = inlined_call_operand.vmem [shape: f32[32,8], index: 4, kind: input, shape index: {}]   ;;  %s1634_s5 = inlined_call_operand.vmem [shape: f32[1,8], index: 5, kind: input, shape index: {}]   ;;  %s1635_s6 = inlined_call_operand.hbm [shape: f32[8,8], index: 6, kind: output, shape index: {}]  }
   0x1   :  { %12 = vsyncpa [#allocation4], 0  ;;  %s1390_s21 = smov [#allocation2]  }
   0x2   :  { %s19_s22 = sshll.u32 %s1390_s21, 4  ;;  %s20_s22 = int_to_ptr.vmem [resolvable:$true] %s19_s22 }
   0x3   :  { %s1354_s23 = scalar_lea.vmem %s20_s22, 128  ;;  %p1359_p1 = scmp.lt.s32.totalorder %s20_s22, %s20_s22 }
   0x4   :  { %p1355_p0 = scmp.ne.s32.totalorder %s20_s22, %s1354_s23  ;;  %p1360_p2 = scmp.lt.s32.totalorder %s1354_s23, %s1354_s23 }
   0x6   :  { %p1361_p3 = por %p1360_p2, %p1359_p1 }
   0x8   :  { %p1362_p4 = pnand %p1361_p3, %p1355_p0 }
   0xa   :  { %1365 = shalt.err (!%p1362_p4)
}
   0xb   :  { %22 = dma.hbm_to_vmem [thread:$0]  %s1629_s0, 128, %s20_s22, [#allocation3]  }
   0xc   :  { %1386 = dma.done.wait [#allocation3], 128  }
   0xd   :  { %1387 = vsyncadd [#allocation3], 4294967168  ;;  %v1391_v0 = vmov 0.0   ;;  %vm1392_vm0 = vmmov 0   ;;  %v38_v1 = vld [vmem:[%s1630_s1 + $0x8] sm:$0xff]  ;;  %v1446_v2 = vld [vmem:[%s1631_s2 + $0x18] sm:$0xff] }
   0xe   :  { %1166 = vmatprep.subr.mxu0 %v1391_v0  ;;  %1173 = vmatprep.subr.mxu1 %v1391_v0  ;;  %v37_v3 = vld [vmem:[%s1630_s1] sm:$0xff]  ;;  %v1455_v4 = vld [vmem:[%s1631_s2 + $0x10] sm:$0xff]  ;;  %vm46_vm1 = vcmask 130048   ;;  %v1462_v6 = vld [vmem:[%s1631_s2 + $0x8] sm:$0xff]  ;;  %s1393_s13 = smov 64   ;;  %vm124_vm2 = vcmask 261120  }
   0xf   :  { %1170 = vmatprep.mubr.msk.f32.mxu0 %vm1392_vm0, %v1391_v0  ;;  %1181 = vmatprep.mubr.msk.f32.mxu1 %vm1392_vm0, %v1391_v0  ;;  %v36_v5 = vld [vmem:[#allocation2] sm:$0xff]  ;;  %vm971_vm3 = vcmask 1040384   ;;  %vm973_vm4 = vcmask 1041408   ;;  %vm975_vm5 = vcmask 1042432   ;;  %vm977_vm6 = vcmask 1043456  }
  0x10   :  { %1167 = vmatpush3.msra.mxu0 %v38_v1  ;;  %1174 = vmatpush3.msra.mxu1 %v1446_v2  ;;  %v1469_v7 = vld [vmem:[%s1631_s2] sm:$0xff]  ;;  %vm979_vm7 = vcmask 1044480   ;;  %vm981_vm8 = vcmask 1045504   ;;  %vm983_vm9 = vcmask 1046528   ;;  %vm1071_vm10 = vcmask 64512  }
  0x11   :  { %1168 = vmatprep.subr.mxu0 %v1391_v0  ;;  %1175 = vmatprep.subr.mxu1 %v1391_v0  ;;  %v1099_v8 = vld [vmem:[%s1632_s3] ss:$0 sm:$0xff]  ;;  %s1394_s3 = smov 32  }
  0x12   :  { %1169 = vmatpush3.msra.mxu0 %v37_v3  ;;  %1176 = vmatpush3.msra.mxu1 %v1455_v4 }
  0x13   :  { %1171 = vmatmul.mubr.msk.f32.vlgmr.msra.gmra.mxu0 %vm46_vm1, %v36_v5  ;;  %1177 = vmatprep.subr.mxu1 %v1391_v0 }
  0x14   :  { %1178 = vmatpush3.msra.mxu1 %v1462_v6  ;;  %1184 = vmatprep.subr.mxu0 %v1391_v0 }
  0x15   :  { %1179 = vmatprep.subr.mxu1 %v1391_v0  ;;  %1185 = vmatpush3.msra.mxu0 %v1446_v2 }
  0x16   :  { %1180 = vmatpush3.msra.mxu1 %v1469_v7  ;;  %1186 = vmatprep.subr.mxu0 %v1391_v0 }
  0x17   :  { %1182 = vmatmul.mubr.f32.vlgmr.msra.gmra.mxu1 %v1391_v0  ;;  %1187 = vmatpush3.msra.mxu0 %v1455_v4 }
  0x18   :  { %1188 = vmatprep.subr.mxu0 %v1391_v0  ;;  %1192 = vmatprep.mubr.msk.f32.mxu0 %vm1392_vm0, %v1391_v0 }
  0x19   :  { %1189 = vmatpush3.msra.mxu0 %v1462_v6  ;;  %1195 = vmatprep.subr.mxu1 %v1391_v0 }
  0x1a   :  { %1190 = vmatprep.subr.mxu0 %v1391_v0  ;;  %1196 = vmatpush3.msra.mxu1 %v1446_v2 }
  0x1b   :  { %1191 = vmatpush3.msra.mxu0 %v1469_v7  ;;  %1197 = vmatprep.subr.mxu1 %v1391_v0 }
  0x1c   :  { %1198 = vmatpush3.msra.mxu1 %v1455_v4  ;;  %1203 = vmatprep.mubr.msk.f32.mxu1 %vm1392_vm0, %v1391_v0 }
  0x1d   :  { %1199 = vmatprep.subr.mxu1 %v1391_v0  ;;  %1206 = vmatprep.subr.mxu0 %v1391_v0 }
  0x1e   :  { %1200 = vmatpush3.msra.mxu1 %v1462_v6 }
  0x1f   :  { %1201 = vmatprep.subr.mxu1 %v1391_v0 }
  0x20   :  { %1202 = vmatpush3.msra.mxu1 %v1469_v7 }
  0x21   :  { %1217 = vmatprep.subr.mxu1 %v1391_v0 }
  0xd3   :  { %v116_v9 = vpop.f32.mrf.mxu0 }
  0xd4   :  { %v1500_v10 = vadd.f32 %v1099_v8, %v116_v9 }
  0xd5   :  { %v1172_v11 = vpop.f32.mrf.mxu0 }
  0xd7   :  { %v194_v12 = vpop.f32.mrf.mxu1 }
  0xd8   :  { %v198_v13 = vadd.f32 %v194_v12, %v1500_v10 }
  0xd9   :  { %v1183_v14 = vpop.f32.mrf.mxu1 }
  0xda   :  { %1278 = vtanh.f32 %v198_v13  ;;  %v1101_v16 = vmul.f32 -1.442695, %v198_v13 }
  0xdc   :  { %1280 = vpow2.f32 %v1101_v16 }
  0xe7   :  { %v1279_v15 = vpop.eup %1278 }
  0xe8   :  { %208 = vrot.lane.b32.xlu0 %v1279_v15, %s1393_s13 }
  0xe9   :  { %v1281_v17 = vpop.eup %1280 }
  0xea   :  { %v202_v18 = vadd.f32 1.0, %v1281_v17 }
  0xec   :  { %1282 = vrcp.f32 %v202_v18 }
  0xf9   :  { %v1283_v19 = vpop.eup %1282 }
  0xfa   :  { %v206_v22 = vmul.f32 0.0, %v1283_v19 }
 0x15a   :  { %v209_v20 = vpop.permute.xlu0 %208 }
 0x15b   :  { %v211_v21 = vmul.f32 %v1283_v19, %v209_v20 }
 0x15d   :  { %213 = vrot.lane.b32.xlu0 %v211_v21, %s1394_s3 }
 0x1cf   :  { %v214_v23 = vpop.permute.xlu0 %213 }
 0x1d0   :  { %v216_v24 = vadd.f32 %v214_v23, %v206_v22 }
 0x1d2   :  { %1284 = vtanh.f32 %v216_v24  ;;  %v310_v40 = vrot.slane %v216_v24, 7 }
 0x1df   :  { %v1285_v25 = vpop.eup %1284 }
 0x1e0   :  { %219 = vrot.lane.b32.xlu1 %v1285_v25, %s1393_s13 }
 0x252   :  { %v220_v26 = vpop.permute.xlu1 %219 }
 0x253   :  { %v1506_v27 = vmul.f32 %v1283_v19, %v220_v26 }
 0x255   :  { %224 = vrot.lane.b32.xlu1 %v1506_v27, %s1394_s3 }
 0x2c7   :  { %v225_v28 = vpop.permute.xlu1 %224 }
 0x2c8   :  { %1193 = vmatmul.mubr.msk.f32.vlgmr.msra.gmra.mxu0 %vm124_vm2, %v225_v28 }
 0x2c9   :  { %1207 = vmatpush3.msra.mxu0 %v1446_v2  ;;  %1214 = vmatprep.mubr.msk.f32.mxu0 %vm1392_vm0, %v1391_v0 }
 0x2ca   :  { %1208 = vmatprep.subr.mxu0 %v1391_v0 }
 0x2cb   :  { %1209 = vmatpush3.msra.mxu0 %v1455_v4 }
 0x2cc   :  { %1210 = vmatprep.subr.mxu0 %v1391_v0 }
 0x2cd   :  { %1211 = vmatpush3.msra.mxu0 %v1462_v6 }
 0x2ce   :  { %1212 = vmatprep.subr.mxu0 %v1391_v0 }
 0x2cf   :  { %1213 = vmatpush3.msra.mxu0 %v1469_v7 }
 0x2d0   :  { %1228 = vmatprep.subr.mxu0 %v1391_v0 }
 0x388   :  { %v294_v29 = vpop.f32.mrf.mxu0 }
 0x389   :  { %v299_v30 = vrot.slane %v294_v29, 7 }
 0x38a   :  { %v1194_v31 = vpop.f32.mrf.mxu0 }
 0x38b   :  { %v301_v32 = vadd.f32 %v299_v30, %v1500_v10 }
 0x38d   :  { %1286 = vtanh.f32 %v301_v32  ;;  %v1103_v34 = vmul.f32 -1.442695, %v301_v32 }
 0x38f   :  { %1288 = vpow2.f32 %v1103_v34 }
 0x39a   :  { %v1287_v33 = vpop.eup %1286 }
 0x39b   :  { %314 = vrot.lane.b32.xlu0 %v1287_v33, %s1393_s13 }
 0x39c   :  { %v1289_v35 = vpop.eup %1288 }
 0x39d   :  { %v305_v36 = vadd.f32 1.0, %v1289_v35 }
 0x39f   :  { %1290 = vrcp.f32 %v305_v36 }
 0x3ac   :  { %v1291_v37 = vpop.eup %1290 }
 0x3ad   :  { %v312_v41 = vmul.f32 %v1291_v37, %v310_v40 }
 0x40d   :  { %v315_v38 = vpop.permute.xlu0 %314 }
 0x40e   :  { %v317_v39 = vmul.f32 %v1291_v37, %v315_v38 }
 0x410   :  { %319 = vrot.lane.b32.xlu1 %v317_v39, %s1394_s3 }
 0x482   :  { %v320_v42 = vpop.permute.xlu1 %319 }
 0x483   :  { %v322_v43 = vadd.f32 %v320_v42, %v312_v41 }
 0x485   :  { %1292 = vtanh.f32 %v322_v43  ;;  %v417_v60 = vrot.slane %v322_v43, 7 }
 0x492   :  { %v1293_v44 = vpop.eup %1292 }
 0x493   :  { %325 = vrot.lane.b32.xlu0 %v1293_v44, %s1393_s13 }
 0x505   :  { %v326_v45 = vpop.permute.xlu0 %325 }
 0x506   :  { %v328_v46 = vmul.f32 %v1291_v37, %v326_v45 }
 0x508   :  { %v330_v47 = vrot.slane %v328_v46, 1  ;;  %v972_v8 = vsel %vm971_vm3, %v1506_v27, %v328_v46 }
 0x50a   :  { %331 = vrot.lane.b32.xlu1 %v330_v47, %s1394_s3 }
 0x57c   :  { %v332_v48 = vpop.permute.xlu1 %331 }
 0x57d   :  { %1204 = vmatmul.mubr.msk.f32.vlgmr.msra.gmra.mxu1 %vm124_vm2, %v332_v48 }
 0x57e   :  { %1218 = vmatpush3.msra.mxu1 %v1446_v2  ;;  %1225 = vmatprep.mubr.msk.f32.mxu1 %vm1392_vm0, %v1391_v0 }
 0x57f   :  { %1219 = vmatprep.subr.mxu1 %v1391_v0 }
 0x580   :  { %1220 = vmatpush3.msra.mxu1 %v1455_v4 }
 0x581   :  { %1221 = vmatprep.subr.mxu1 %v1391_v0 }
 0x582   :  { %1222 = vmatpush3.msra.mxu1 %v1462_v6 }
 0x583   :  { %1223 = vmatprep.subr.mxu1 %v1391_v0 }
 0x584   :  { %1224 = vmatpush3.msra.mxu1 %v1469_v7 }
 0x585   :  { %1239 = vmatprep.subr.mxu1 %v1391_v0 }
 0x63d   :  { %v401_v49 = vpop.f32.mrf.mxu1 }
 0x63e   :  { %v406_v50 = vrot.slane %v401_v49, 6 }
 0x63f   :  { %v1205_v51 = vpop.f32.mrf.mxu1 }
 0x640   :  { %v408_v52 = vadd.f32 %v406_v50, %v1500_v10 }
 0x642   :  { %1294 = vtanh.f32 %v408_v52  ;;  %v1105_v54 = vmul.f32 -1.442695, %v408_v52 }
 0x644   :  { %1296 = vpow2.f32 %v1105_v54 }
 0x64f   :  { %v1295_v53 = vpop.eup %1294 }
 0x650   :  { %421 = vrot.lane.b32.xlu0 %v1295_v53, %s1393_s13 }
 0x651   :  { %v1297_v55 = vpop.eup %1296 }
 0x652   :  { %v412_v56 = vadd.f32 1.0, %v1297_v55 }
 0x654   :  { %1298 = vrcp.f32 %v412_v56 }
 0x661   :  { %v1299_v57 = vpop.eup %1298 }
 0x662   :  { %v419_v61 = vmul.f32 %v1299_v57, %v417_v60 }
 0x6c2   :  { %v422_v58 = vpop.permute.xlu0 %421 }
 0x6c3   :  { %v424_v59 = vmul.f32 %v1299_v57, %v422_v58 }
 0x6c5   :  { %426 = vrot.lane.b32.xlu1 %v424_v59, %s1394_s3 }
 0x737   :  { %v427_v62 = vpop.permute.xlu1 %426 }
 0x738   :  { %v429_v63 = vadd.f32 %v427_v62, %v419_v61 }
 0x73a   :  { %1300 = vtanh.f32 %v429_v63  ;;  %v524_v24 = vrot.slane %v429_v63, 7 }
 0x747   :  { %v1301_v1 = vpop.eup %1300 }
 0x748   :  { %432 = vrot.lane.b32.xlu0 %v1301_v1, %s1393_s13 }
 0x7ba   :  { %v433_v3 = vpop.permute.xlu0 %432 }
 0x7bb   :  { %v435_v5 = vmul.f32 %v1299_v57, %v433_v3 }
 0x7bd   :  { %v437_v9 = vrot.slane %v435_v5, 2  ;;  %v974_v11 = vsel %vm973_vm4, %v972_v8, %v435_v5 }
 0x7bf   :  { %438 = vrot.lane.b32.xlu1 %v437_v9, %s1394_s3 }
 0x831   :  { %v439_v12 = vpop.permute.xlu1 %438 }
 0x832   :  { %1215 = vmatmul.mubr.msk.f32.vlgmr.msra.gmra.mxu0 %vm124_vm2, %v439_v12 }
 0x833   :  { %1229 = vmatpush3.msra.mxu0 %v1446_v2  ;;  %1236 = vmatprep.mubr.msk.f32.mxu0 %vm1392_vm0, %v1391_v0 }
 0x834   :  { %1230 = vmatprep.subr.mxu0 %v1391_v0 }
 0x835   :  { %1231 = vmatpush3.msra.mxu0 %v1455_v4 }
 0x836   :  { %1232 = vmatprep.subr.mxu0 %v1391_v0 }
 0x837   :  { %1233 = vmatpush3.msra.mxu0 %v1462_v6 }
 0x838   :  { %1234 = vmatprep.subr.mxu0 %v1391_v0 }
 0x839   :  { %1235 = vmatpush3.msra.mxu0 %v1469_v7 }
 0x83a   :  { %1250 = vmatprep.subr.mxu0 %v1391_v0 }
 0x8f2   :  { %v508_v13 = vpop.f32.mrf.mxu0 }
 0x8f3   :  { %v513_v14 = vrot.slane %v508_v13, 5 }
 0x8f4   :  { %v1216_v15 = vpop.f32.mrf.mxu0 }
 0x8f5   :  { %v515_v16 = vadd.f32 %v513_v14, %v1500_v10 }
 0x8f7   :  { %1302 = vtanh.f32 %v515_v16  ;;  %v1107_v18 = vmul.f32 -1.442695, %v515_v16 }
 0x8f9   :  { %1304 = vpow2.f32 %v1107_v18 }
 0x904   :  { %v1303_v17 = vpop.eup %1302 }
 0x905   :  { %528 = vrot.lane.b32.xlu0 %v1303_v17, %s1393_s13 }
 0x906   :  { %v1305_v19 = vpop.eup %1304 }
 0x907   :  { %v519_v20 = vadd.f32 1.0, %v1305_v19 }
 0x909   :  { %1306 = vrcp.f32 %v519_v20 }
 0x916   :  { %v1307_v21 = vpop.eup %1306 }
 0x917   :  { %v526_v25 = vmul.f32 %v1307_v21, %v524_v24 }
 0x977   :  { %v529_v22 = vpop.permute.xlu0 %528 }
 0x978   :  { %v531_v23 = vmul.f32 %v1307_v21, %v529_v22 }
 0x97a   :  { %533 = vrot.lane.b32.xlu1 %v531_v23, %s1394_s3 }
 0x9ec   :  { %v534_v26 = vpop.permute.xlu1 %533 }
 0x9ed   :  { %v536_v27 = vadd.f32 %v534_v26, %v526_v25 }
 0x9ef   :  { %1308 = vtanh.f32 %v536_v27  ;;  %v631_v45 = vrot.slane %v536_v27, 7 }
 0x9fc   :  { %v1309_v28 = vpop.eup %1308 }
 0x9fd   :  { %539 = vrot.lane.b32.xlu0 %v1309_v28, %s1393_s13 }
 0xa6f   :  { %v540_v29 = vpop.permute.xlu0 %539 }
 0xa70   :  { %v542_v30 = vmul.f32 %v1307_v21, %v540_v29 }
 0xa72   :  { %v544_v31 = vrot.slane %v542_v30, 3  ;;  %v976_v32 = vsel %vm975_vm5, %v974_v11, %v542_v30 }
 0xa74   :  { %545 = vrot.lane.b32.xlu1 %v544_v31, %s1394_s3 }
 0xae6   :  { %v546_v33 = vpop.permute.xlu1 %545 }
 0xae7   :  { %1226 = vmatmul.mubr.msk.f32.vlgmr.msra.gmra.mxu1 %vm124_vm2, %v546_v33 }
 0xae8   :  { %1240 = vmatpush3.msra.mxu1 %v1446_v2  ;;  %1247 = vmatprep.mubr.msk.f32.mxu1 %vm1392_vm0, %v1391_v0 }
 0xae9   :  { %1241 = vmatprep.subr.mxu1 %v1391_v0 }
 0xaea   :  { %1242 = vmatpush3.msra.mxu1 %v1455_v4 }
 0xaeb   :  { %1243 = vmatprep.subr.mxu1 %v1391_v0 }
 0xaec   :  { %1244 = vmatpush3.msra.mxu1 %v1462_v6 }
 0xaed   :  { %1245 = vmatprep.subr.mxu1 %v1391_v0 }
 0xaee   :  { %1246 = vmatpush3.msra.mxu1 %v1469_v7 }
 0xaef   :  { %1261 = vmatprep.subr.mxu1 %v1391_v0 }
 0xba7   :  { %v615_v34 = vpop.f32.mrf.mxu1 }
 0xba8   :  { %v620_v35 = vrot.slane %v615_v34, 4 }
 0xba9   :  { %v1227_v36 = vpop.f32.mrf.mxu1 }
 0xbaa   :  { %v622_v37 = vadd.f32 %v620_v35, %v1500_v10 }
 0xbac   :  { %1310 = vtanh.f32 %v622_v37  ;;  %v1109_v39 = vmul.f32 -1.442695, %v622_v37 }
 0xbae   :  { %1312 = vpow2.f32 %v1109_v39 }
 0xbb9   :  { %v1311_v38 = vpop.eup %1310 }
 0xbba   :  { %635 = vrot.lane.b32.xlu0 %v1311_v38, %s1393_s13 }
 0xbbb   :  { %v1313_v40 = vpop.eup %1312 }
 0xbbc   :  { %v626_v41 = vadd.f32 1.0, %v1313_v40 }
 0xbbe   :  { %1314 = vrcp.f32 %v626_v41 }
 0xbcb   :  { %v1315_v42 = vpop.eup %1314 }
 0xbcc   :  { %v633_v46 = vmul.f32 %v1315_v42, %v631_v45 }
 0xc2c   :  { %v636_v43 = vpop.permute.xlu0 %635 }
 0xc2d   :  { %v638_v44 = vmul.f32 %v1315_v42, %v636_v43 }
 0xc2f   :  { %640 = vrot.lane.b32.xlu1 %v638_v44, %s1394_s3 }
 0xca1   :  { %v641_v47 = vpop.permute.xlu1 %640 }
 0xca2   :  { %v643_v48 = vadd.f32 %v641_v47, %v633_v46 }
 0xca4   :  { %1316 = vtanh.f32 %v643_v48 }
 0xcb1   :  { %v1317_v49 = vpop.eup %1316 }
 0xcb2   :  { %646 = vrot.lane.b32.xlu0 %v1317_v49, %s1393_s13 }
 0xd24   :  { %v647_v50 = vpop.permute.xlu0 %646 }
 0xd25   :  { %v649_v51 = vmul.f32 %v1315_v42, %v647_v50  ;;  %v987_v50 = vld [vmem:[%s1633_s4 + $0x10] sm:$0xff] }
 0xd27   :  { %v651_v52 = vrot.slane %v649_v51, 4  ;;  %v978_v53 = vsel %vm977_vm6, %v976_v32, %v649_v51  ;;  %v986_v51 = vld [vmem:[%s1633_s4 + $0x8] sm:$0xff] }
 0xd29   :  { %652 = vrot.lane.b32.xlu1 %v651_v52, %s1394_s3  ;;  %v985_v52 = vld [vmem:[%s1633_s4] sm:$0xff] }
 0xd9b   :  { %v653_v54 = vpop.permute.xlu1 %652 }
 0xd9c   :  { %1237 = vmatmul.mubr.msk.f32.vlgmr.msra.gmra.mxu0 %vm124_vm2, %v653_v54 }
 0xd9d   :  { %1251 = vmatpush3.msra.mxu0 %v1446_v2  ;;  %1258 = vmatprep.mubr.msk.f32.mxu0 %vm1392_vm0, %v1391_v0 }
 0xd9e   :  { %1252 = vmatprep.subr.mxu0 %v1391_v0 }
 0xd9f   :  { %1253 = vmatpush3.msra.mxu0 %v1455_v4 }
 0xda0   :  { %1254 = vmatprep.subr.mxu0 %v1391_v0 }
 0xda1   :  { %1255 = vmatpush3.msra.mxu0 %v1462_v6 }
 0xda2   :  { %1256 = vmatprep.subr.mxu0 %v1391_v0 }
 0xda3   :  { %1257 = vmatpush3.msra.mxu0 %v1469_v7  ;;  %v738_v7 = vrot.slane %v643_v48, 7 }
 0xe5c   :  { %v722_v55 = vpop.f32.mrf.mxu0 }
 0xe5d   :  { %v727_v56 = vrot.slane %v722_v55, 3 }
 0xe5e   :  { %v1238_v57 = vpop.f32.mrf.mxu0 }
 0xe5f   :  { %v729_v2 = vadd.f32 %v727_v56, %v1500_v10 }
 0xe61   :  { %1318 = vtanh.f32 %v729_v2  ;;  %v1111_v59 = vmul.f32 -1.442695, %v729_v2  ;;  %v1116_v2 = vld [vmem:[%s1634_s5] ss:$0 sm:$0xff] }
 0xe63   :  { %1320 = vpow2.f32 %v1111_v59 }
 0xe6e   :  { %v1319_v58 = vpop.eup %1318 }
 0xe6f   :  { %742 = vrot.lane.b32.xlu0 %v1319_v58, %s1393_s13 }
 0xe70   :  { %v1321_v4 = vpop.eup %1320 }
 0xe71   :  { %v733_v60 = vadd.f32 1.0, %v1321_v4 }
 0xe73   :  { %1322 = vrcp.f32 %v733_v60 }
 0xe80   :  { %v1323_v61 = vpop.eup %1322 }
 0xe81   :  { %v740_v63 = vmul.f32 %v1323_v61, %v738_v7 }
 0xee1   :  { %v743_v6 = vpop.permute.xlu0 %742 }
 0xee2   :  { %v745_v62 = vmul.f32 %v1323_v61, %v743_v6 }
 0xee4   :  { %747 = vrot.lane.b32.xlu1 %v745_v62, %s1394_s3 }
 0xf56   :  { %v748_v1 = vpop.permute.xlu1 %747 }
 0xf57   :  { %v750_v3 = vadd.f32 %v748_v1, %v740_v63 }
 0xf59   :  { %1324 = vtanh.f32 %v750_v3  ;;  %v845_v25 = vrot.slane %v750_v3, 7 }
 0xf66   :  { %v1325_v5 = vpop.eup %1324 }
 0xf67   :  { %753 = vrot.lane.b32.xlu0 %v1325_v5, %s1393_s13 }
 0xfd9   :  { %v754_v8 = vpop.permute.xlu0 %753 }
 0xfda   :  { %v756_v9 = vmul.f32 %v1323_v61, %v754_v8 }
 0xfdc   :  { %v758_v11 = vrot.slane %v756_v9, 5  ;;  %v980_v12 = vsel %vm979_vm7, %v978_v53, %v756_v9 }
 0xfde   :  { %759 = vrot.lane.b32.xlu1 %v758_v11, %s1394_s3 }
0x1050   :  { %v760_v13 = vpop.permute.xlu1 %759 }
0x1051   :  { %1248 = vmatmul.mubr.msk.f32.vlgmr.msra.gmra.mxu1 %vm124_vm2, %v760_v13 }
0x1052   :  { %1269 = vmatprep.mubr.msk.f32.mxu1 %vm1392_vm0, %v1391_v0 }
0x1111   :  { %v829_v14 = vpop.f32.mrf.mxu1 }
0x1112   :  { %v834_v15 = vrot.slane %v829_v14, 2 }
0x1113   :  { %v1249_v16 = vpop.f32.mrf.mxu1 }
0x1114   :  { %v836_v17 = vadd.f32 %v834_v15, %v1500_v10 }
0x1116   :  { %1326 = vtanh.f32 %v836_v17  ;;  %v1113_v19 = vmul.f32 -1.442695, %v836_v17 }
0x1118   :  { %1328 = vpow2.f32 %v1113_v19 }
0x1123   :  { %v1327_v18 = vpop.eup %1326 }
0x1124   :  { %849 = vrot.lane.b32.xlu0 %v1327_v18, %s1393_s13 }
0x1125   :  { %v1329_v20 = vpop.eup %1328 }
0x1126   :  { %v840_v21 = vadd.f32 1.0, %v1329_v20 }
0x1128   :  { %1330 = vrcp.f32 %v840_v21 }
0x1135   :  { %v1331_v22 = vpop.eup %1330 }
0x1136   :  { %v847_v26 = vmul.f32 %v1331_v22, %v845_v25 }
0x1196   :  { %v850_v23 = vpop.permute.xlu0 %849 }
0x1197   :  { %v852_v24 = vmul.f32 %v1331_v22, %v850_v23 }
0x1199   :  { %854 = vrot.lane.b32.xlu1 %v852_v24, %s1394_s3 }
0x120b   :  { %v855_v27 = vpop.permute.xlu1 %854 }
0x120c   :  { %v857_v28 = vadd.f32 %v855_v27, %v847_v26 }
0x120e   :  { %1332 = vtanh.f32 %v857_v28  ;;  %v952_v46 = vrot.slane %v857_v28, 7 }
0x121b   :  { %v1333_v29 = vpop.eup %1332 }
0x121c   :  { %860 = vrot.lane.b32.xlu0 %v1333_v29, %s1393_s13 }
0x128e   :  { %v861_v30 = vpop.permute.xlu0 %860 }
0x128f   :  { %v863_v31 = vmul.f32 %v1331_v22, %v861_v30 }
0x1291   :  { %v865_v32 = vrot.slane %v863_v31, 6  ;;  %v982_v33 = vsel %vm981_vm8, %v980_v12, %v863_v31 }
0x1293   :  { %866 = vrot.lane.b32.xlu1 %v865_v32, %s1394_s3 }
0x1305   :  { %v867_v34 = vpop.permute.xlu1 %866 }
0x1306   :  { %1259 = vmatmul.mubr.msk.f32.vlgmr.msra.gmra.mxu0 %vm124_vm2, %v867_v34 }
0x13c6   :  { %v936_v35 = vpop.f32.mrf.mxu0 }
0x13c7   :  { %v941_v36 = vrot.slane %v936_v35, 1 }
0x13c8   :  { %v1260_v37 = vpop.f32.mrf.mxu0 }
0x13c9   :  { %v943_v38 = vadd.f32 %v941_v36, %v1500_v10  ;;  %v988_v10 = vld [vmem:[%s1633_s4 + $0x18] sm:$0xff]  ;;  %s1395_s4 = smov [#allocation5]  }
0x13ca   :  { %1262 = vmatpush3.msra.mxu1 %v988_v10  ;;  %s1090_s24 = sshll.u32 %s1395_s4, 4  ;;  %s1091_s24 = int_to_ptr.vmem [resolvable:$true] %s1090_s24 }
0x13cb   :  { %1334 = vtanh.f32 %v943_v38  ;;  %v1115_v40 = vmul.f32 -1.442695, %v943_v38  ;;  %1263 = vmatprep.subr.mxu1 %v1391_v0  ;;  %s1366_s5 = scalar_lea.vmem %s1091_s24, 128  ;;  %p1371_p6 = scmp.lt.s32.totalorder %s1091_s24, %s1091_s24 }
0x13cc   :  { %1264 = vmatpush3.msra.mxu1 %v987_v50  ;;  %p1367_p5 = scmp.ne.s32.totalorder %s1091_s24, %s1366_s5  ;;  %p1372_p7 = scmp.lt.s32.totalorder %s1366_s5, %s1366_s5 }
0x13cd   :  { %1336 = vpow2.f32 %v1115_v40  ;;  %1265 = vmatprep.subr.mxu1 %v1391_v0 }
0x13ce   :  { %1266 = vmatpush3.msra.mxu1 %v986_v51  ;;  %p1373_p8 = por %p1372_p7, %p1371_p6 }
0x13cf   :  { %1267 = vmatprep.subr.mxu1 %v1391_v0 }
0x13d0   :  { %1268 = vmatpush3.msra.mxu1 %v985_v52  ;;  %p1374_p9 = pnand %p1373_p8, %p1367_p5 }
0x13d8   :  { %v1335_v39 = vpop.eup %1334 }
0x13d9   :  { %956 = vrot.lane.b32.xlu0 %v1335_v39, %s1393_s13 }
0x13da   :  { %v1337_v41 = vpop.eup %1336 }
0x13db   :  { %v947_v42 = vadd.f32 1.0, %v1337_v41 }
0x13dd   :  { %1338 = vrcp.f32 %v947_v42 }
0x13ea   :  { %v1339_v43 = vpop.eup %1338 }
0x13eb   :  { %v954_v47 = vmul.f32 %v1339_v43, %v952_v46 }
0x144b   :  { %v957_v44 = vpop.permute.xlu0 %956 }
0x144c   :  { %v959_v45 = vmul.f32 %v1339_v43, %v957_v44 }
0x144e   :  { %961 = vrot.lane.b32.xlu1 %v959_v45, %s1394_s3 }
0x14c0   :  { %v962_v48 = vpop.permute.xlu1 %961 }
0x14c1   :  { %v964_v49 = vadd.f32 %v962_v48, %v954_v47 }
0x14c3   :  { %1340 = vtanh.f32 %v964_v49 }
0x14d0   :  { %v1341_v53 = vpop.eup %1340 }
0x14d1   :  { %967 = vrot.lane.b32.xlu0 %v1341_v53, %s1393_s13 }
0x1543   :  { %v968_v54 = vpop.permute.xlu0 %967 }
0x1544   :  { %v970_v55 = vmul.f32 %v1339_v43, %v968_v54 }
0x1546   :  { %v984_v56 = vsel %vm983_vm9, %v982_v33, %v970_v55 }
0x1547   :  { %997 = vrot.lane.b32.xlu1 %v984_v56, %s1394_s3 }
0x15b9   :  { %v998_v57 = vpop.permute.xlu1 %997 }
0x15ba   :  { %1270 = vmatmul.mubr.msk.f32.vlgmr.msra.gmra.mxu1 %vm124_vm2, %v998_v57 }
0x167a   :  { %v1067_v58 = vpop.f32.mrf.mxu1 }
0x167b   :  { %v1068_v0 = vadd.f32 %v1116_v2, %v1067_v58 }
0x167c   :  { %v1271_v59 = vpop.f32.mrf.mxu1 }
0x167d   :  { %v1072_v4 = vsel %vm1071_vm10, %v1068_v0, -inf }
0x167e   :  { %1073 = vmax.xlane.f32.xlu0 %v1072_v4 }
0x1707   :  { %v1074_v60 = vpop.xlane.xlu0 %1073 }
0x1708   :  { %v1075_v61 = vsub.f32 %v1068_v0, %v1074_v60 }
0x170a   :  { %v1076_v6 = vmul.f32 1.442695, %v1075_v61 }
0x170c   :  { %1342 = vpow2.f32 %v1076_v6 }
0x1719   :  { %v1343_v62 = vpop.eup %1342 }
0x171a   :  { %v1078_v7 = vsel %vm1071_vm10, %v1343_v62, 0.0 }
0x171b   :  { %1079 = vadd.xlane.f32.xlu1 %v1078_v7 }
0x17a4   :  { %v1080_v63 = vpop.xlane.xlu1 %1079 }
0x17a5   :  { %1344 = vrcp.f32 %v1080_v63 }
0x17b2   :  { %v1345_v1 = vpop.eup %1344 }
0x17b3   :  { %v1082_v3 = vmul.f32 %v1345_v1, %v1343_v62 }
0x17b5   :  { %1083 = vst.msk [vmem:[#allocation5] sm:$0xff] %vm1071_vm10, %v1082_v3 }
0x17b6   :  { %1377 = shalt.err (!%p1374_p9)
}
0x17b7   :  { %1093 = dma.vmem_to_hbm [thread:$0]  %s1091_s24, 128, %s1635_s6, [#allocation4]  }
0x17b8   :  { %1388 = dma.done.wait [#allocation4], 128  }
0x17b9   :  { %1389 = vsyncadd [#allocation4], 4294967168 }
0x17ba   :  { %1097 = vsyncpa [#allocation3], 1 }
0x17bb   :  { %1098 = vsyncpa [#allocation4], 1 }

</bundles_post_ra>
